<compile_context>
chip_gen: v7x
topology: tpu7x:2x2x1
jax: 0.10.0
libtpu: 0.0.40
codegen_flags: <defaults>
</compile_context>

<pallas_src>
import functools

import jax
import jax.numpy as jnp
from jax.experimental import pallas as pl
from jax.experimental.pallas import tpu as pltpu

_MIB = 1024 * 1024


def _round_up(x, m):
    return (x + m - 1) // m * m


def _tpu_kind():
    try:
        return jax.devices()[0].device_kind.lower()
    except Exception:
        return ""


def _vmem_capacity_bytes():
    """Physical VMEM per TensorCore; generation-aware with a safe fallback."""
    try:
        cap = int(pltpu.get_tpu_info().vmem_capacity_bytes)
        if cap > 0:
            return cap
    except Exception:
        pass
    kind = _tpu_kind()
    if "v7" in kind or "7x" in kind:
        return 64 * _MIB
    if "v5" in kind or "v6" in kind:
        return 128 * _MIB
    return 64 * _MIB  # unknown chip: be conservative


def _default_tiles():
    """(tile_m, tile_h) defaults per TPU generation (see perf review)."""
    kind = _tpu_kind()
    if "v7" in kind or "7x" in kind:
        return 512, 256          # ~310 flop/byte crossover, 64 MiB VMEM
    if "v6" in kind:
        return 1024, 512         # ~650 flop/byte crossover, 128 MiB VMEM
    if "v5" in kind:
        return 512, 512          # ~240 flop/byte crossover
    return 512, 256              # unknown: v7x-safe


def _pick_tile_h(H, desired):
    """Multiple-of-128 hidden tile.  Prefer an exact divisor of H near
    `desired`; otherwise return `desired` and let the caller zero-pad H."""
    desired = max(128, (desired // 128) * 128)
    if H <= desired:
        return _round_up(H, 128)
    t = desired
    while t >= 128:
        if H % t == 0:
            return t
        t -= 128
    return desired  # no divisor: weights get zero-padded (numerically exact)


def _vmem_estimate(tile_m, tile_h, D, compute_itemsize):
    """Explicit working-set estimate, including the f32 temporaries."""
    return (
        2 * tile_m * D * compute_itemsize            # x tile (double buffered)
        + 2 * D * (2 * tile_h) * compute_itemsize    # fused W1/W3 tile (dbl buf)
        + 2 * tile_h * D * compute_itemsize          # W2^T tile (dbl buf)
        + 2 * tile_m * D * compute_itemsize          # output tile, compute dtype
        + tile_m * D * 4                             # f32 accumulator scratch
        + 3 * tile_m * tile_h * 4                    # f32 gate/up/hidden temps
    )


def _ffn_kernel(x_ref, w13_ref, w2t_ref, o_ref, acc_ref, *, tile_h):
    """Grid = (m_tiles, h_tiles); h (hidden reduction) is innermost.

    x_ref   : [TM, D]          activation tile
    w13_ref : [D, 2*TH]        fused [W1^T | W3^T] tile (pre-blocked, contiguous)
    w2t_ref : [TH, D]          W2^T tile (pre-blocked, contiguous)
    o_ref   : [TM, D]          output tile (compute dtype), written on last h
    acc_ref : [TM, D] f32      VMEM accumulator across hidden tiles
    """
    h = pl.program_id(1)

    @pl.when(h == 0)
    def _():
        acc_ref[...] = jnp.zeros_like(acc_ref)

    x = x_ref[...]
    # Single fused MXU pass: [TM, D] @ [D, 2*TH] -> [TM, 2*TH] (f32).
    gate_up = jnp.dot(x, w13_ref[...], preferred_element_type=jnp.float32)
    gate = gate_up[:, :tile_h]
    up = gate_up[:, tile_h:]
    # SiLU(gate) * up in f32 (EUP sigmoid + VPU muls).
    hidden = (gate * jax.nn.sigmoid(gate)) * up
    # Partial down-projection accumulated in f32.
    acc_ref[...] += jnp.dot(hidden.astype(w2t_ref.dtype), w2t_ref[...],
                            preferred_element_type=jnp.float32)

    @pl.when(h == pl.num_programs(1) - 1)
    def _():
        o_ref[...] = acc_ref[...].astype(o_ref.dtype)


@functools.partial(
    jax.jit,
    static_argnames=("tile_m", "tile_h", "compute_dtype", "vmem_limit"))
def _ffn_impl(x, w1, w2, w3, *, tile_m, tile_h, compute_dtype, vmem_limit):
    B, S, D = x.shape
    H = w1.shape[0]
    M = B * S
    M_pad = _round_up(M, tile_m)
    H_pad = _round_up(H, tile_h)
    Hb = H_pad // tile_h

    # ---- host-side layout prep (plain XLA ops, cached under jit) -----------
    x2d = x.reshape(M, D).astype(compute_dtype)
    if M_pad != M:
        x2d = jnp.pad(x2d, ((0, M_pad - M), (0, 0)))

    w1t = w1.T.astype(compute_dtype)   # [D, H]
    w3t = w3.T.astype(compute_dtype)   # [D, H]
    w2t = w2.T.astype(compute_dtype)   # [H, D]
    if H_pad != H:
        pad_c = H_pad - H
        w1t = jnp.pad(w1t, ((0, 0), (0, pad_c)))
        w3t = jnp.pad(w3t, ((0, 0), (0, pad_c)))
        w2t = jnp.pad(w2t, ((0, pad_c), (0, 0)))

    # Pre-blocked, contiguous weight tiles:
    #   w13 : [Hb, D, 2*TH]  (per block: gate cols | up cols)
    #   w2b : [Hb, TH, D]
    w13 = jnp.concatenate(
        [w1t.reshape(D, Hb, tile_h), w3t.reshape(D, Hb, tile_h)], axis=-1)
    w13 = jnp.transpose(w13, (1, 0, 2))
    w2b = w2t.reshape(Hb, tile_h, D)

    grid = (M_pad // tile_m, Hb)

    out = pl.pallas_call(
        functools.partial(_ffn_kernel, tile_h=tile_h),
        out_shape=jax.ShapeDtypeStruct((M_pad, D), compute_dtype),
        grid_spec=pltpu.PrefetchScalarGridSpec(
            num_scalar_prefetch=0,
            grid=grid,
            in_specs=[
                pl.BlockSpec((tile_m, D), lambda m, h: (m, 0)),          # x
                pl.BlockSpec((None, D, 2 * tile_h), lambda m, h: (h, 0, 0)),  # W1|W3
                pl.BlockSpec((None, tile_h, D), lambda m, h: (h, 0, 0)),      # W2^T
            ],
            out_specs=pl.BlockSpec((tile_m, D), lambda m, h: (m, 0)),
            scratch_shapes=[pltpu.VMEM((tile_m, D), jnp.float32)],
        ),
        compiler_params=pltpu.CompilerParams(
            dimension_semantics=("parallel", "arbitrary"),
            vmem_limit_bytes=vmem_limit,
        ),
    )(x2d, w13, w2b)

    return out[:M].reshape(B, S, D).astype(x.dtype)


def feed_forward(x, w1, w2, w3, tile_m=None, tile_h=None,
                 compute_dtype=jnp.bfloat16):
    """x: [B, S, D]; w1, w3: [H, D]; w2: [D, H] (PyTorch nn.Linear layout).

    Returns [B, S, D] in x.dtype.
    """
    B, S, D = x.shape
    H = w1.shape[0]
    M = B * S
    assert D % 128 == 0, "model dim must be a multiple of 128 (TPU lane width)"

    # ---- generation-aware tile selection (pure Python, trace-time) ---------
    dflt_m, dflt_h = _default_tiles()
    if tile_m is None:
        tile_m = dflt_m
    if tile_h is None:
        tile_h = dflt_h

    tile_m = max(16, _round_up(min(tile_m, _round_up(M, 16)), 16))
    tile_h = _pick_tile_h(H, tile_h)

    # ---- generation-aware VMEM cap + auto-shrink ---------------------------
    c_item = jnp.dtype(compute_dtype).itemsize
    vmem_cap = _vmem_capacity_bytes()
    budget = vmem_cap - 8 * _MIB
    while _vmem_estimate(tile_m, tile_h, D, c_item) > budget:
        if tile_m > 128:
            tile_m = max(128, _round_up(tile_m // 2, 16))
        elif tile_h > 128:
            tile_h = max(128, (tile_h // 2 // 128) * 128)
        else:
            break

    # v7x megacore: keep the number of m-tiles even (>=2) so both TensorCores
    # stay busy; v5e/v6e are single-TC so this is a no-op there.
    kind = _tpu_kind()
    if ("v7" in kind or "7x" in kind):
        m_tiles = -(-M // tile_m)
        if m_tiles > 1 and m_tiles % 2 == 1:
            m_tiles += 1
            tile_m = max(16, _round_up(-(-M // m_tiles), 16))

    est = _vmem_estimate(tile_m, tile_h, D, c_item)
    vmem_limit = int(min(budget, max(est + 4 * _MIB, 32 * _MIB)))
    vmem_limit = max(vmem_limit, 16 * _MIB)

    return _ffn_impl(x, w1, w2, w3, tile_m=int(tile_m), tile_h=int(tile_h),
                     compute_dtype=compute_dtype, vmem_limit=vmem_limit)


def llama_hidden_dim(hidden_dim, multiple_of, ffn_dim_multiplier):
    hidden_dim = int(2 * hidden_dim / 3)
    if ffn_dim_multiplier is not None:
        hidden_dim = int(ffn_dim_multiplier * hidden_dim)
    return multiple_of * ((hidden_dim + multiple_of - 1) // multiple_of)


def reference_ffn(x, w1, w2, w3):
    gate = jnp.einsum("bsd,hd->bsh", x, w1)
    up = jnp.einsum("bsd,hd->bsh", x, w3)
    h = jax.nn.silu(gate) * up
    return jnp.einsum("bsh,dh->bsd", h, w2)


if __name__ == "__main__":
    # Module config (small but consistent with the Llama FeedForward formula).
    dim = 128
    hidden_dim_in = 4 * dim            # Llama passes 4*dim
    multiple_of = 128
    ffn_dim_multiplier = None
    hidden = llama_hidden_dim(hidden_dim_in, multiple_of, ffn_dim_multiplier)  # -> 384

    B, S = 2, 8

    key = jax.random.PRNGKey(0)
    kx, k1, k2, k3 = jax.random.split(key, 4)
    x = jax.random.normal(kx, (B, S, dim), dtype=jnp.float32)
    # Deterministic weights (PyTorch nn.Linear weight layouts, no bias).
    w1 = jax.random.normal(k1, (hidden, dim), dtype=jnp.float32) * 0.02
    w2 = jax.random.normal(k2, (dim, hidden), dtype=jnp.float32) * 0.02
    w3 = jax.random.normal(k3, (hidden, dim), dtype=jnp.float32) * 0.02

    ref = reference_ffn(x, w1, w2, w3)

    # f32 compute path: tight numerical check of the kernel structure.
    out_f32 = jax.block_until_ready(
        feed_forward(x, w1, w2, w3, compute_dtype=jnp.float32))
    assert out_f32.shape == (B, S, dim)
    assert jnp.allclose(out_f32, ref, atol=2e-4, rtol=1e-4), "f32 mismatch vs reference"

    # bf16 compute path (default / production): looser tolerance vs f32 reference.
    out_bf16 = jax.block_until_ready(feed_forward(x, w1, w2, w3))
    assert out_bf16.shape == (B, S, dim)
    assert jnp.allclose(out_bf16, ref, atol=5e-3, rtol=5e-2), "bf16 mismatch vs reference"

    # Also exercise a non-divisible hidden tiling path explicitly (zero-padded H).
    out_pad = jax.block_until_ready(
        feed_forward(x, w1, w2, w3, tile_h=256, compute_dtype=jnp.float32))
    assert jnp.allclose(out_pad, ref, atol=2e-4, rtol=1e-4), "padded-H mismatch"

    print("KERNEL_OK")
</pallas_src>

<mosaic_0001>
module attributes {stable_mosaic.version = 11 : i64} {
  func.func @_ffn_kernel(%arg0: i32, %arg1: i32, %arg2: memref<16x128xf32, #tpu.memory_space<vmem>>, %arg3: memref<1x128x256xf32, #tpu.memory_space<vmem>>, %arg4: memref<1x128x128xf32, #tpu.memory_space<vmem>>, %arg5: memref<16x128xf32, #tpu.memory_space<vmem>>, %arg6: memref<16x128xf32, #tpu.memory_space<vmem>>) attributes {dimension_semantics = [#tpu.dimension_semantics<parallel>, #tpu.dimension_semantics<arbitrary>], iteration_bounds = array<i64: 1, 3>, scalar_prefetch = 0 : i64, scratch_operands = 1 : i64, tpu.core_type = #tpu.core_type<tc>, window_params = [{transform_indices = @transform_0, window_bounds = array<i64: 16, 128>}, {transform_indices = @transform_1, window_bounds = array<i64: 1, 128, 256>}, {transform_indices = @transform_2, window_bounds = array<i64: 1, 128, 128>}, {transform_indices = @transform_3, window_bounds = array<i64: 16, 128>}]} {
    %c0_i32 = arith.constant 0 : i32
    %0 = arith.cmpi eq, %arg1, %c0_i32 : i32
    %1 = arith.extui %0 : i1 to i32
    %c0_i32_0 = arith.constant 0 : i32
    %2 = arith.cmpi ne, %1, %c0_i32_0 : i32
    scf.if %2 {
      %cst_15 = arith.constant 0.000000e+00 : f32
      %25 = vector.broadcast %cst_15 : f32 to vector<16x128xf32>
      %c0_16 = arith.constant 0 : index
      %c0_17 = arith.constant 0 : index
      %26 = vector.load %arg6[%c0_16, %c0_17] : memref<16x128xf32, #tpu.memory_space<vmem>>, vector<16x128xf32>
      tpu.vector_store %arg6[%c0_16, %c0_17], %25 {strides = array<i32>} : memref<16x128xf32, #tpu.memory_space<vmem>>, vector<16x128xf32>,
    } else {
    }
    %c0 = arith.constant 0 : index
    %c0_1 = arith.constant 0 : index
    %3 = vector.load %arg2[%c0, %c0_1] : memref<16x128xf32, #tpu.memory_space<vmem>>, vector<16x128xf32>
    %c0_2 = arith.constant 0 : index
    %c0_3 = arith.constant 0 : index
    %c0_4 = arith.constant 0 : index
    %4 = vector.load %arg3[%c0_2, %c0_3, %c0_4] : memref<1x128x256xf32, #tpu.memory_space<vmem>>, vector<1x128x256xf32>
    %5 = vector.shape_cast %4 : vector<1x128x256xf32> to vector<128x256xf32>
    %cst = arith.constant dense<0.000000e+00> : vector<16x256xf32>
    %6 = tpu.matmul %3, %5, %cst {dimension_numbers = #tpu.dot_dimension_numbers<[1], [0], [0], [1], [0, 0, 1, 1], [], []>} : vector<16x128xf32>, vector<128x256xf32>, vector<16x256xf32> -> vector<16x256xf32>
    %7 = vector.extract_strided_slice %6 {offsets = [0, 0], sizes = [16, 128], strides = [1, 1]} : vector<16x256xf32> to vector<16x128xf32>
    %8 = vector.extract_strided_slice %6 {offsets = [0, 128], sizes = [16, 128], strides = [1, 1]} : vector<16x256xf32> to vector<16x128xf32>
    %9 = arith.negf %7 : vector<16x128xf32>
    %10 = math.exp %9 : vector<16x128xf32>
    %cst_5 = arith.constant 1.000000e+00 : f32
    %11 = vector.broadcast %cst_5 : f32 to vector<16x128xf32>
    %12 = arith.addf %11, %10 : vector<16x128xf32>
    %13 = arith.divf %11, %12 : vector<16x128xf32>
    %14 = arith.mulf %7, %13 : vector<16x128xf32>
    %15 = arith.mulf %14, %8 : vector<16x128xf32>
    %c0_6 = arith.constant 0 : index
    %c0_7 = arith.constant 0 : index
    %16 = vector.load %arg6[%c0_6, %c0_7] : memref<16x128xf32, #tpu.memory_space<vmem>>, vector<16x128xf32>
    %c0_8 = arith.constant 0 : index
    %c0_9 = arith.constant 0 : index
    %c0_10 = arith.constant 0 : index
    %17 = vector.load %arg4[%c0_8, %c0_9, %c0_10] : memref<1x128x128xf32, #tpu.memory_space<vmem>>, vector<1x128x128xf32>
    %18 = vector.shape_cast %17 : vector<1x128x128xf32> to vector<128x128xf32>
    %cst_11 = arith.constant dense<0.000000e+00> : vector<16x128xf32>
    %19 = tpu.matmul %15, %18, %cst_11 {dimension_numbers = #tpu.dot_dimension_numbers<[1], [0], [0], [1], [0, 0, 1, 1], [], []>} : vector<16x128xf32>, vector<128x128xf32>, vector<16x128xf32> -> vector<16x128xf32>
    %20 = arith.addf %16, %19 : vector<16x128xf32>
    %c0_12 = arith.constant 0 : index
    %c0_13 = arith.constant 0 : index
    %21 = vector.load %arg6[%c0_12, %c0_13] : memref<16x128xf32, #tpu.memory_space<vmem>>, vector<16x128xf32>
    tpu.vector_store %arg6[%c0_12, %c0_13], %20 {strides = array<i32>} : memref<16x128xf32, #tpu.memory_space<vmem>>, vector<16x128xf32>,
    %c2_i32 = arith.constant 2 : i32
    %22 = arith.cmpi eq, %arg1, %c2_i32 : i32
    %23 = arith.extui %22 : i1 to i32
    %c0_i32_14 = arith.constant 0 : i32
    %24 = arith.cmpi ne, %23, %c0_i32_14 : i32
    scf.if %24 {
      %c0_15 = arith.constant 0 : index
      %c0_16 = arith.constant 0 : index
      %25 = vector.load %arg6[%c0_15, %c0_16] : memref<16x128xf32, #tpu.memory_space<vmem>>, vector<16x128xf32>
      %c0_17 = arith.constant 0 : index
      %c0_18 = arith.constant 0 : index
      %26 = vector.load %arg5[%c0_17, %c0_18] : memref<16x128xf32, #tpu.memory_space<vmem>>, vector<16x128xf32>
      tpu.vector_store %arg5[%c0_17, %c0_18], %25 {strides = array<i32>} : memref<16x128xf32, #tpu.memory_space<vmem>>, vector<16x128xf32>,
    } else {
    }
    return
  }
  func.func @transform_0(%arg0: i32, %arg1: i32) -> (i32, i32) {
    %c0_i32 = arith.constant 0 : i32
    %c0_i32_0 = arith.constant 0 : i32
    return %arg0, %c0_i32 : i32, i32
  }
  func.func @transform_1(%arg0: i32, %arg1: i32) -> (i32, i32, i32) {
    %c0_i32 = arith.constant 0 : i32
    %c0_i32_0 = arith.constant 0 : i32
    %c0_i32_1 = arith.constant 0 : i32
    return %arg1, %c0_i32, %c0_i32_0 : i32, i32, i32
  }
  func.func @transform_2(%arg0: i32, %arg1: i32) -> (i32, i32, i32) {
    %c0_i32 = arith.constant 0 : i32
    %c0_i32_0 = arith.constant 0 : i32
    %c0_i32_1 = arith.constant 0 : i32
    return %arg1, %c0_i32, %c0_i32_0 : i32, i32, i32
  }
  func.func @transform_3(%arg0: i32, %arg1: i32) -> (i32, i32) {
    %c0_i32 = arith.constant 0 : i32
    %c0_i32_0 = arith.constant 0 : i32
    return %arg0, %c0_i32 : i32, i32
  }
}

</mosaic_0001>

<bundles_post_ra>
// kernel: _ffn_impl.1
= control target key start
LH: loop header
LB: loop body
LE: loop exit
PB: predicated region body
PF: predicated region fallthrough
CT: control target
= control target key end

     0   :  { %8 = vsyncpa [#allocation4], 0  ;;  %s802_s12 = smov 0   ;;  %s804_s13 = smov 0   ;;  %s928_s0 = inlined_call_operand.vmem [shape: f32[16,128], index: 0, kind: input, shape index: {}]   ;;  %s929_s1 = inlined_call_operand.vmem [shape: f32[3,128,256], index: 1, kind: input, shape index: {}]   ;;  %s930_s2 = inlined_call_operand.vmem [shape: f32[3,128,128], index: 2, kind: input, shape index: {}]   ;;  %s931_s3 = inlined_call_operand.hbm [shape: f32[16,128], index: 3, kind: output, shape index: {}]  }
   0x1   :  { %s806_s14 = smov 0  }
   0x2 LB: > { %s544_s15 = sadd.s32 4294967295, %s775_s14   ;;  %s23_s16 = sadd.s32 1, %s771_s13  ;;  %s775_s14 = sphi %s806_s14, %s14_s14   ;;  %s771_s13 = sphi %s804_s13, %s934_s13   ;;  %s767_s12 = sphi %s802_s12, %s933_s12  }
   0x3   : > { %p24_p0 = scmp.ge.s32.totalorder %s23_s16, 3  ;;  %p548_p1 = scmp.ge.s32.totalorder %s775_s14, 1 }
   0x4   : > { %p171_p2 = scmp.lt.s32.totalorder %s775_s14, 4 }
   0x5   : > { %s936_s16 = smov (%p24_p0, %s23_s16), 0 }
   0x6   : > { %p172_p3 = pnand %p548_p1, %p171_p2 }
   0x7   : > { %p206_p4 = scmp.lt.s32.totalorder (!%p172_p3), %s767_s12, 2  ;;  %p553_p5 = scmp.ne.s32.totalorder (!%p172_p3), %s767_s12, 0 }
   0x8   : > { %175 = sbr.rel (%p172_p3) target bundleno = 554 (0x22a), region = 32 }
   0xf   : > { %s207_s17 = scalar_select %p206_p4, %s767_s12, 2 }
  0x10   : > { %220 = sbr.rel (%p553_p5) target bundleno = 23 (0x17), region = 36  ;;  %v777_v0 = vmov (!%p553_p5), 0.0  }
  0x11   : > { %s561_s18 = sshll.u32 %s207_s17, 8  ;;  %s562_s19 = sshll.u32 %s207_s17, 7  ;;  %221 = vst [vmem:[#allocation2] sm:$0xff] (!%p553_p5), %v777_v0  ;;  %222 = vst [vmem:[#allocation2 + $0x8] sm:$0xff] (!%p553_p5), %v777_v0 }
  0x12   : > { %s828_s22 = scalar_lea.vmem %s929_s1, %s561_s18  ;;  %s833_s25 = scalar_lea.vmem %s930_s2, %s562_s19 }
  0x17 PF: > { %v226_v1 = vld [vmem:[%s828_s22 + $0x8] sm:$0xff]  ;;  %v228_v2 = vld [vmem:[%s828_s22 + $0x18] sm:$0xff]  ;;  %v225_v3 = vld [vmem:[%s828_s22] sm:$0xff]  ;;  %v778_v8 = vmov 0.0   ;;  %p556_p6 = scmp.ne.s32.totalorder %s767_s12, 2 }
  0x18   : > { %v616_v4 = vpack.c.bf16 %v228_v2, %v226_v1  ;;  %v227_v5 = vld [vmem:[%s828_s22 + $0x10] sm:$0xff]  ;;  %v230_v6 = vld [vmem:[%s828_s22 + $0x28] sm:$0xff]  ;;  %v232_v7 = vld [vmem:[%s828_s22 + $0x38] sm:$0xff]  ;;  %321 = vmatprep.mubr.f32.mxu0 %v778_v8 }
  0x19   : > { %v618_v9 = vpack.c.bf16 %v227_v5, %v225_v3  ;;  %v620_v10 = vpack.c.bf16 %v232_v7, %v230_v6  ;;  %v229_v11 = vld [vmem:[%s828_s22 + $0x20] sm:$0xff]  ;;  %v231_v12 = vld [vmem:[%s828_s22 + $0x30] sm:$0xff]  ;;  %v234_v13 = vld [vmem:[%s828_s22 + $0x48] sm:$0xff] }
  0x1a   : > { %617 = vmatprep.subr.bf16.mxu0 %v616_v4  ;;  %v236_v14 = vld [vmem:[%s828_s22 + $0x58] sm:$0xff]  ;;  %v622_v15 = vpack.c.bf16 %v231_v12, %v229_v11  ;;  %v233_v17 = vld [vmem:[%s828_s22 + $0x40] sm:$0xff]  ;;  %v235_v18 = vld [vmem:[%s828_s22 + $0x50] sm:$0xff] }
  0x1b   : > { %619 = vmatpush1.bf16.msra.mxu0 %v618_v9  ;;  %v624_v16 = vpack.c.bf16 %v236_v14, %v234_v13  ;;  %v238_v19 = vld [vmem:[%s828_s22 + $0x68] sm:$0xff]  ;;  %v240_v20 = vld [vmem:[%s828_s22 + $0x78] sm:$0xff]  ;;  %v626_v21 = vpack.c.bf16 %v235_v18, %v233_v17  ;;  %v237_v23 = vld [vmem:[%s828_s22 + $0x60] sm:$0xff] }
  0x1c   : > { %621 = vmatprep.subr.bf16.mxu0 %v620_v10  ;;  %v628_v22 = vpack.c.bf16 %v240_v20, %v238_v19  ;;  %v239_v24 = vld [vmem:[%s828_s22 + $0x70] sm:$0xff]  ;;  %v242_v25 = vld [vmem:[%s828_s22 + $0x88] sm:$0xff]  ;;  %v244_v26 = vld [vmem:[%s828_s22 + $0x98] sm:$0xff] }
  0x1d   : > { %v630_v27 = vpack.c.bf16 %v239_v24, %v237_v23  ;;  %v632_v28 = vpack.c.bf16 %v244_v26, %v242_v25  ;;  %v241_v29 = vld [vmem:[%s828_s22 + $0x80] sm:$0xff]  ;;  %v243_v30 = vld [vmem:[%s828_s22 + $0x90] sm:$0xff]  ;;  %v246_v31 = vld [vmem:[%s828_s22 + $0xa8] sm:$0xff] }
  0x1e   : > { %v248_v32 = vld [vmem:[%s828_s22 + $0xb8] sm:$0xff]  ;;  %v634_v33 = vpack.c.bf16 %v243_v30, %v241_v29  ;;  %v245_v35 = vld [vmem:[%s828_s22 + $0xa0] sm:$0xff]  ;;  %v247_v36 = vld [vmem:[%s828_s22 + $0xb0] sm:$0xff] }
  0x1f   : > { %623 = vmatpush1.bf16.msra.mxu0 %v622_v15  ;;  %v636_v34 = vpack.c.bf16 %v248_v32, %v246_v31  ;;  %v250_v37 = vld [vmem:[%s828_s22 + $0xc8] sm:$0xff]  ;;  %v252_v38 = vld [vmem:[%s828_s22 + $0xd8] sm:$0xff]  ;;  %v638_v39 = vpack.c.bf16 %v247_v36, %v245_v35  ;;  %v249_v41 = vld [vmem:[%s828_s22 + $0xc0] sm:$0xff] }
  0x20   : > { %625 = vmatprep.subr.bf16.mxu0 %v624_v16  ;;  %v640_v40 = vpack.c.bf16 %v252_v38, %v250_v37  ;;  %v251_v42 = vld [vmem:[%s828_s22 + $0xd0] sm:$0xff]  ;;  %v254_v43 = vld [vmem:[%s828_s22 + $0xe8] sm:$0xff]  ;;  %v256_v44 = vld [vmem:[%s828_s22 + $0xf8] sm:$0xff] }
  0x21   : > { %v642_v45 = vpack.c.bf16 %v251_v42, %v249_v41  ;;  %v644_v46 = vpack.c.bf16 %v256_v44, %v254_v43  ;;  %v253_v47 = vld [vmem:[%s828_s22 + $0xe0] sm:$0xff]  ;;  %v255_v48 = vld [vmem:[%s828_s22 + $0xf0] sm:$0xff]  ;;  %v224_v51 = vld [vmem:[%s928_s0 + $0x8] sm:$0xff] }
  0x22   : > { %v646_v49 = vpack.c.bf16 %v255_v48, %v253_v47  ;;  %v223_v50 = vld [vmem:[%s928_s0] sm:$0xff]  ;;  %v353_v53 = vld [vmem:[%s833_s25 + $0x8] sm:$0xff]  ;;  %v354_v55 = vld [vmem:[%s833_s25 + $0x10] sm:$0xff] }
  0x23   : > { %627 = vmatpush1.bf16.msra.mxu0 %v626_v21  ;;  %v352_v52 = vld [vmem:[%s833_s25] sm:$0xff]  ;;  %v355_v56 = vld [vmem:[%s833_s25 + $0x18] sm:$0xff]  ;;  %v357_v59 = vld [vmem:[%s833_s25 + $0x28] sm:$0xff] }
  0x24   : > { %629 = vmatprep.subr.bf16.mxu0 %v628_v22  ;;  %v648_v54 = vpack.c.bf16 %v353_v53, %v352_v52  ;;  %v652_v57 = vpack.c.bf16 %v355_v56, %v354_v55  ;;  %v356_v58 = vld [vmem:[%s833_s25 + $0x20] sm:$0xff]  ;;  %v358_v61 = vld [vmem:[%s833_s25 + $0x30] sm:$0xff]  ;;  %v359_v62 = vld [vmem:[%s833_s25 + $0x38] sm:$0xff] }
  0x25   : > { %v656_v60 = vpack.c.bf16 %v357_v59, %v356_v58  ;;  %v660_v63 = vpack.c.bf16 %v359_v62, %v358_v61  ;;  %v360_v0 = vld [vmem:[%s833_s25 + $0x40] sm:$0xff]  ;;  %v361_v1 = vld [vmem:[%s833_s25 + $0x48] sm:$0xff]  ;;  %v362_v3 = vld [vmem:[%s833_s25 + $0x50] sm:$0xff] }
  0x26   : > { %649 = vmatprep.subr.bf16.mxu1 %v648_v54  ;;  %v664_v2 = vpack.c.bf16 %v361_v1, %v360_v0  ;;  %v363_v4 = vld [vmem:[%s833_s25 + $0x58] sm:$0xff]  ;;  %v364_v6 = vld [vmem:[%s833_s25 + $0x60] sm:$0xff]  ;;  %v365_v7 = vld [vmem:[%s833_s25 + $0x68] sm:$0xff] }
  0x27   : > { %631 = vmatpush1.bf16.msra.mxu0 %v630_v27  ;;  %651 = vmatpush3.bf16.msra.mxu1 %v648_v54  ;;  %v668_v5 = vpack.c.bf16 %v363_v4, %v362_v3  ;;  %v366_v9 = vld [vmem:[%s833_s25 + $0x70] sm:$0xff]  ;;  %v367_v10 = vld [vmem:[%s833_s25 + $0x78] sm:$0xff]  ;;  %v350_v29 = vld [vmem:[#allocation2] sm:$0xff] }
  0x28   : > { %633 = vmatprep.subr.bf16.mxu0 %v632_v28  ;;  %653 = vmatprep.subr.bf16.mxu1 %v652_v57  ;;  %v676_v11 = vpack.c.bf16 %v367_v10, %v366_v9  ;;  %v351_v28 = vld [vmem:[#allocation2 + $0x8] sm:$0xff] }
  0x2b   : > { %635 = vmatpush1.bf16.msra.mxu0 %v634_v33  ;;  %655 = vmatpush3.bf16.msra.mxu1 %v652_v57 }
  0x2c   : > { %637 = vmatprep.subr.bf16.mxu0 %v636_v34  ;;  %657 = vmatprep.subr.bf16.mxu1 %v656_v60 }
  0x2f   : > { %639 = vmatpush1.bf16.msra.mxu0 %v638_v39  ;;  %659 = vmatpush3.bf16.msra.mxu1 %v656_v60 }
  0x30   : > { %641 = vmatprep.subr.bf16.mxu0 %v640_v40  ;;  %661 = vmatprep.subr.bf16.mxu1 %v660_v63 }
  0x33   : > { %643 = vmatpush1.bf16.msra.mxu0 %v642_v45  ;;  %663 = vmatpush3.bf16.msra.mxu1 %v660_v63 }
  0x34   : > { %645 = vmatprep.subr.bf16.mxu0 %v644_v46  ;;  %665 = vmatprep.subr.bf16.mxu1 %v664_v2 }
  0x37   : > { %647 = vmatpush1.bf16.msra.mxu0 %v646_v49  ;;  %667 = vmatpush3.bf16.msra.mxu1 %v664_v2 }
  0x38   : > { %669 = vmatprep.subr.bf16.mxu1 %v668_v5 }
  0x3a   : > { %322 = vmatmul.mubr.f32.vlgmr.msra.gmra.mrb[0].mxu0 %v223_v50 }
  0x3b   : > { %327 = vmatprep.mubr.f32.mxu0 %v778_v8  ;;  %671 = vmatpush3.bf16.msra.mxu1 %v668_v5  ;;  %v672_v8 = vpack.c.bf16 %v365_v7, %v364_v6 }
  0x3d   : > { %673 = vmatprep.subr.bf16.mxu1 %v672_v8 }
  0x3e   : > { %328 = vmatmul.mubr.f32.gmra.mrb[2].mxu0 %v224_v51 }
  0x3f   : > { %675 = vmatpush3.bf16.msra.mxu1 %v672_v8 }
  0x40   : > { %677 = vmatprep.subr.bf16.mxu1 %v676_v11 }
  0x43   : > { %679 = vmatpush3.bf16.msra.mxu1 %v676_v11 }
 0x10d   : > { %v323_v12 = vpop.f32.mrb[0].mxu0 }
 0x10e   : > { %v554_v13 = vmul.f32 -1.442695, %v323_v12  ;;  %v325_v14 = vpop.f32.mrb[1].mxu0 }
 0x110   : > { %715 = vpow2.f32 %v554_v13 }
 0x111   : > { %v329_v15 = vpop.f32.mrb[2].mxu0 }
 0x112   : > { %v555_v16 = vmul.f32 -1.442695, %v329_v15  ;;  %v331_v17 = vpop.f32.mrb[3].mxu0 }
 0x114   : > { %717 = vpow2.f32 %v555_v16 }
 0x11a   : > { %v716_v18 = vpop.eup %715 }
 0x11b   : > { %v340_v19 = vadd.f32 1.0, %v716_v18 }
 0x11d   : > { %719 = vrcp.f32 %v340_v19 }
 0x11e   : > { %v718_v20 = vpop.eup %717 }
 0x11f   : > { %v341_v21 = vadd.f32 1.0, %v718_v20 }
 0x121   : > { %721 = vrcp.f32 %v341_v21 }
 0x127   : > { %v720_v22 = vpop.eup %719 }
 0x128   : > { %v346_v23 = vmul.f32 %v720_v22, %v323_v12 }
 0x12a   : > { %v348_v24 = vmul.f32 %v346_v23, %v325_v14 }
 0x12b   : > { %v722_v25 = vpop.eup %721 }
 0x12c   : > { %v347_v26 = vmul.f32 %v722_v25, %v329_v15  ;;  %613 = vmatprep.mubr.f32.mxu1 %v348_v24 }
 0x12e   : > { %v349_v27 = vmul.f32 %v347_v26, %v331_v17 }
 0x130   : > { %614 = vmatmul.mubr.f32.vlgmr.msra.gmra.mrb[0].mxu1 %v349_v27 }
 0x201   : > { %450 = sbr.rel (%p556_p6) target bundleno = 528 (0x210), region = 40 }
 0x203   : > { %v615_v30 = vpop.f32.mrb[0].mxu1 }
 0x204   : > { %v444_v31 = vadd.f32 %v615_v30, %v351_v28  ;;  %v434_v32 = vpop.f32.mrb[1].mxu1 }
 0x205   : > { %v443_v33 = vadd.f32 %v434_v32, %v350_v29 }
 0x206   : > { %446 = vst [vmem:[#allocation2 + $0x8] sm:$0xff] %v444_v31 }
 0x207   : > { %445 = vst [vmem:[#allocation2] sm:$0xff] %v443_v33 }
 0x20d   : > { %v452_v35 = vld [vmem:[#allocation2 + $0x8] sm:$0xff] }
 0x20e   : > { %v451_v34 = vld [vmem:[#allocation2] sm:$0xff]  ;;  %454 = vst [vmem:[#allocation3 + $0x8] sm:$0xff] %v452_v35 }
 0x20f   : > { %453 = vst [vmem:[#allocation3] sm:$0xff] %v451_v34 }
 0x210 PF: > { %p893_p7 = scmp.eq.s32.totalorder %s544_s15, 2  ;;  %s779_s4 = smov [#allocation3]  }
 0x211   : > { %s464_s5 = sshll.u32 %s779_s4, 4  ;;  %s465_s5 = int_to_ptr.vmem [resolvable:$true] %s464_s5 }
 0x212   : > { %s723_s6 = scalar_lea.vmem %s465_s5, 256  ;;  %p730_p11 = scmp.lt.s32.totalorder %s465_s5, %s465_s5 }
 0x213   : > { %p724_p8 = scmp.ne.s32.totalorder %s465_s5, %s723_s6  ;;  %p731_p12 = scmp.lt.s32.totalorder %s723_s6, %s723_s6 }
 0x215   : > { %p725_p9 = pnand %p724_p8, %p893_p7  ;;  %p732_p13 = por %p731_p12, %p730_p11 }
 0x217   : > { %p726_p10 = pneg %p725_p9 }
 0x219   : > { %p733_p0 = pnand %p732_p13, %p726_p10 }
 0x21b   : > { %736 = shalt.err (!%p733_p0)
}
 0x21c   : > { %s737_s9 = scalar_lea.hbm %s931_s3, 256 }
 0x21d   : > { %p738_p1 = scmp.ne.s32.totalorder %s931_s3, %s737_s9  ;;  %p743_p4 = scmp.lt.u32.totalorder %s737_s9, %s931_s3 }
 0x21f   : > { %p739_p2 = pnand %p738_p1, %p893_p7 }
 0x221   : > { %p740_p3 = pneg %p739_p2 }
 0x223   : > { %p745_p5 = pnand %p743_p4, %p740_p3 }
 0x225   : > { %748 = shalt.err (!%p745_p5)
}
 0x226   : > { %s780_s17 = smov 128   ;;  %s781_s18 = smov 8  }
 0x227   : > { %681 = dma.vmem_to_hbm [thread:$0]  (%p893_p7), %s465_s5, 256, %s931_s3, [#allocation4], %s780_s17, %s780_s17, %s781_s18  }
 0x228   : > { %762 = dma.done.wait (%p893_p7), [#allocation4], 256  }
 0x229   : > { %764 = vsyncadd (%p893_p7), [#allocation4], 4294967040 }
 0x22a PF: > { %s14_s14 = sadd.s32 1, %s775_s14   ;;  %s933_s12 = smov %s771_s13 }
 0x22b   : > { %p11_p6 = scmp.ge.s32.totalorder %s14_s14, 5   ;;  %s934_s13 = smov %s936_s16 }
 0x22d   :  { %13 = sbr.rel (!%p11_p6) target bundleno = 2 (0x2), region = 74 }
 0x234   :  { %480 = vsyncpa [#allocation4], 1 }
 0x235   :  { %482 = vsyncpa [#allocation4 + $0x1], 1 }

</bundles_post_ra>
